<compile_context>
chip_gen: v6e
topology: v6e:2x2x1
jax: 0.10.0
libtpu: 0.0.40
codegen_flags: <defaults>
</compile_context>

<pallas_src>
import jax
import jax.numpy as jnp
from jax.experimental import pallas as pl
from jax.experimental.pallas import tpu as pltpu


def _round_up(x, m):
    return ((x + m - 1) // m) * m


def _layernorm2d_kernel(x_ref, g_ref, b_ref, o_ref):
    # x_ref / o_ref blocks: (C, T); g_ref / b_ref blocks: (C, 1)
    x = x_ref[...].astype(jnp.float32)                          # (C, T)
    c = x.shape[0]

    # Two-pass statistics over channels (sublane dim): robust vs large means.
    mean = jnp.mean(x, axis=0, keepdims=True)                   # (1, T)
    d = x - mean
    # torch.std default is unbiased -> divide by (C - 1)
    var = jnp.sum(d * d, axis=0, keepdims=True) / jnp.float32(c - 1)
    denom = jnp.sqrt(var) + jnp.float32(1e-6)                   # (1, T)

    # EUP approximate reciprocal + one Newton refinement -> ~f32-exact 1/denom,
    # computed once per spatial column instead of a full-block divide.
    inv = pl.reciprocal(denom, approx=True)
    inv = inv * (jnp.float32(2.0) - denom * inv)

    g = g_ref[...].astype(jnp.float32)                          # (C, 1)
    b = b_ref[...].astype(jnp.float32)                          # (C, 1)
    o_ref[...] = (g * (d * inv) + b).astype(o_ref.dtype)


def layernorm2d(x, affine, bias):
    """x: (N, C, H, W); affine, bias: (C,). Returns (N, C, H, W)."""
    N, C, H, W = x.shape
    HW = H * W

    # Lane-dense spatial tile: multiple of 128, capped so an f32 working copy
    # of one (C, T) block stays <= ~2 MiB (double-buffered in+out fits v5e's
    # 16 MiB scoped VMEM and v7x's 64 MiB physical VMEM comfortably).
    max_block_bytes = 2 << 20
    t_cap = max(128, (max_block_bytes // (C * 4)) // 128 * 128)
    T = min(t_cap, 2048, _round_up(HW, 128))
    HWp = _round_up(HW, T)

    x_flat = x.reshape(N, C, HW)
    if HWp != HW:
        # Zero padding is safe: spatial positions are independent and the
        # padded columns are sliced off below (values stay finite).
        x_flat = jnp.pad(x_flat, ((0, 0), (0, 0), (0, HWp - HW)))

    g = affine.reshape(C, 1)
    b = bias.reshape(C, 1)

    out = pl.pallas_call(
        _layernorm2d_kernel,
        out_shape=jax.ShapeDtypeStruct((N, C, HWp), x.dtype),
        grid_spec=pltpu.PrefetchScalarGridSpec(
            num_scalar_prefetch=0,
            grid=(N, HWp // T),
            in_specs=[
                # None squeezes the size-1 batch dim out of the kernel ref.
                pl.BlockSpec((None, C, T), lambda n, s: (n, 0, s)),
                pl.BlockSpec((C, 1), lambda n, s: (0, 0)),
                pl.BlockSpec((C, 1), lambda n, s: (0, 0)),
            ],
            out_specs=pl.BlockSpec((None, C, T), lambda n, s: (n, 0, s)),
        ),
        compiler_params=pltpu.CompilerParams(
            dimension_semantics=("parallel", "parallel"),
            vmem_limit_bytes=32 << 20,
        ),
    )(x_flat, g, b)

    if HWp != HW:
        out = out[:, :, :HW]
    return out.reshape(N, C, H, W)


def _reference(x, affine, bias):
    xf = x.astype(jnp.float32)
    mean = jnp.mean(xf, axis=1, keepdims=True)
    var = jnp.sum((xf - mean) ** 2, axis=1, keepdims=True) / (x.shape[1] - 1)
    std = jnp.sqrt(var)
    out = (affine[None, :, None, None] * (xf - mean) / (std + 1e-6)
           + bias[None, :, None, None])
    return out.astype(x.dtype)


if __name__ == "__main__":
    key = jax.random.PRNGKey(0)
    k_x, k_g, k_b = jax.random.split(key, 3)

    N, C, H, W = 2, 4, 16, 16
    x = jax.random.normal(k_x, (N, C, H, W), dtype=jnp.float32)
    # Module __init__ uses ones/zeros; use deterministic non-trivial values so
    # the affine/bias broadcast path is actually exercised.
    affine = 1.0 + 0.1 * jax.random.normal(k_g, (C,), dtype=jnp.float32)
    bias = 0.1 * jax.random.normal(k_b, (C,), dtype=jnp.float32)

    out = layernorm2d(x, affine, bias)
    out = jax.block_until_ready(out)

    ref = _reference(x, affine, bias)
    assert out.shape == (N, C, H, W)
    assert jnp.allclose(out, ref, atol=1e-5, rtol=1e-5), (
        f"max abs err = {jnp.max(jnp.abs(out - ref))}")

    print("KERNEL_OK")
</pallas_src>

<mosaic_0001>
module attributes {stable_mosaic.version = 11 : i64} {
  func.func @_layernorm2d_kernel(%arg0: i32, %arg1: i32, %arg2: memref<1x4x256xf32, #tpu.memory_space<vmem>>, %arg3: memref<4x1xf32, #tpu.memory_space<vmem>>, %arg4: memref<4x1xf32, #tpu.memory_space<vmem>>, %arg5: memref<1x4x256xf32, #tpu.memory_space<vmem>>) attributes {dimension_semantics = [#tpu.dimension_semantics<parallel>, #tpu.dimension_semantics<parallel>], iteration_bounds = array<i64: 2, 1>, scalar_prefetch = 0 : i64, scratch_operands = 0 : i64, tpu.core_type = #tpu.core_type<tc>, window_params = [{transform_indices = @transform_0, window_bounds = array<i64: 1, 4, 256>}, {pipeline_mode = #tpu.pipeline_mode<synchronous>, transform_indices = @transform_1, window_bounds = array<i64: 4, 1>}, {pipeline_mode = #tpu.pipeline_mode<synchronous>, transform_indices = @transform_2, window_bounds = array<i64: 4, 1>}, {transform_indices = @transform_3, window_bounds = array<i64: 1, 4, 256>}]} {
    %c0 = arith.constant 0 : index
    %c0_0 = arith.constant 0 : index
    %c0_1 = arith.constant 0 : index
    %0 = vector.load %arg2[%c0, %c0_0, %c0_1] : memref<1x4x256xf32, #tpu.memory_space<vmem>>, vector<1x4x256xf32>
    %1 = vector.shape_cast %0 : vector<1x4x256xf32> to vector<4x256xf32>
    %cst = arith.constant dense<0.000000e+00> : vector<256xf32>
    %2 = vector.multi_reduction <add>, %1, %cst [0] : vector<4x256xf32> to vector<256xf32>
    %3 = vector.shape_cast %2 : vector<256xf32> to vector<1x256xf32>
    %cst_2 = arith.constant 4.000000e+00 : f32
    %4 = vector.broadcast %cst_2 : f32 to vector<1x256xf32>
    %5 = arith.divf %3, %4 : vector<1x256xf32>
    %6 = vector.broadcast %5 : vector<1x256xf32> to vector<4x256xf32>
    %7 = arith.subf %1, %6 : vector<4x256xf32>
    %8 = arith.mulf %7, %7 : vector<4x256xf32>
    %cst_3 = arith.constant dense<0.000000e+00> : vector<256xf32>
    %9 = vector.multi_reduction <add>, %8, %cst_3 [0] : vector<4x256xf32> to vector<256xf32>
    %10 = vector.shape_cast %9 : vector<256xf32> to vector<1x256xf32>
    %cst_4 = arith.constant 3.000000e+00 : f32
    %11 = vector.broadcast %cst_4 : f32 to vector<1x256xf32>
    %12 = arith.divf %10, %11 : vector<1x256xf32>
    %13 = math.sqrt %12 : vector<1x256xf32>
    %cst_5 = arith.constant 9.99999997E-7 : f32
    %14 = vector.broadcast %cst_5 : f32 to vector<1x256xf32>
    %15 = arith.addf %13, %14 : vector<1x256xf32>
    %16 = tpu.reciprocal %15 {approx = true} : vector<1x256xf32> -> vector<1x256xf32>
    %17 = arith.mulf %15, %16 : vector<1x256xf32>
    %cst_6 = arith.constant 2.000000e+00 : f32
    %18 = vector.broadcast %cst_6 : f32 to vector<1x256xf32>
    %19 = arith.subf %18, %17 : vector<1x256xf32>
    %20 = arith.mulf %16, %19 : vector<1x256xf32>
    %c0_7 = arith.constant 0 : index
    %c0_8 = arith.constant 0 : index
    %21 = vector.load %arg3[%c0_7, %c0_8] : memref<4x1xf32, #tpu.memory_space<vmem>>, vector<4x1xf32>
    %c0_9 = arith.constant 0 : index
    %c0_10 = arith.constant 0 : index
    %22 = vector.load %arg4[%c0_9, %c0_10] : memref<4x1xf32, #tpu.memory_space<vmem>>, vector<4x1xf32>
    %23 = vector.broadcast %20 : vector<1x256xf32> to vector<4x256xf32>
    %24 = arith.mulf %7, %23 : vector<4x256xf32>
    %25 = vector.broadcast %21 : vector<4x1xf32> to vector<4x256xf32>
    %26 = arith.mulf %25, %24 : vector<4x256xf32>
    %27 = vector.broadcast %22 : vector<4x1xf32> to vector<4x256xf32>
    %28 = arith.addf %26, %27 : vector<4x256xf32>
    %c0_11 = arith.constant 0 : index
    %c0_12 = arith.constant 0 : index
    %c0_13 = arith.constant 0 : index
    %29 = vector.load %arg5[%c0_11, %c0_12, %c0_13] : memref<1x4x256xf32, #tpu.memory_space<vmem>>, vector<1x4x256xf32>
    %30 = vector.shape_cast %29 : vector<1x4x256xf32> to vector<4x256xf32>
    %31 = vector.shape_cast %28 : vector<4x256xf32> to vector<1x4x256xf32>
    tpu.vector_store %arg5[%c0_11, %c0_12, %c0_13], %31 {strides = array<i32>} : memref<1x4x256xf32, #tpu.memory_space<vmem>>, vector<1x4x256xf32>,
    return
  }
  func.func @transform_0(%arg0: i32, %arg1: i32) -> (i32, i32, i32) {
    %c0_i32 = arith.constant 0 : i32
    %c0_i32_0 = arith.constant 0 : i32
    return %arg0, %c0_i32, %arg1 : i32, i32, i32
  }
  func.func @transform_1(%arg0: i32, %arg1: i32) -> (i32, i32) {
    %c0_i32 = arith.constant 0 : i32
    %c0_i32_0 = arith.constant 0 : i32
    %c0_i32_1 = arith.constant 0 : i32
    return %c0_i32, %c0_i32_0 : i32, i32
  }
  func.func @transform_2(%arg0: i32, %arg1: i32) -> (i32, i32) {
    %c0_i32 = arith.constant 0 : i32
    %c0_i32_0 = arith.constant 0 : i32
    %c0_i32_1 = arith.constant 0 : i32
    return %c0_i32, %c0_i32_0 : i32, i32
  }
  func.func @transform_3(%arg0: i32, %arg1: i32) -> (i32, i32, i32) {
    %c0_i32 = arith.constant 0 : i32
    %c0_i32_0 = arith.constant 0 : i32
    return %arg0, %c0_i32, %arg1 : i32, i32, i32
  }
}

</mosaic_0001>

<bundles_post_ra>
// kernel: tpu_custom_call.1
= control target key start
LH: loop header
LB: loop body
LE: loop exit
PB: predicated region body
PF: predicated region fallthrough
CT: control target
= control target key end

     0   :  { %8 = vsyncpa [#allocation3], 0  ;;  %s780_s0 = inlined_call_operand.hbm [shape: f32[2,4,256], index: 0, kind: input, shape index: {}]   ;;  %s781_s1 = inlined_call_operand.vmem [shape: f32[4,1], index: 1, kind: input, shape index: {}]   ;;  %s782_s2 = inlined_call_operand.vmem [shape: f32[4,1], index: 2, kind: input, shape index: {}]   ;;  %s783_s3 = inlined_call_operand.hbm [shape: f32[2,4,256], index: 3, kind: output, shape index: {}]  }
   0x1   :  { %10 = vsyncpa [#allocation3 + $0x1], 0 }
   0x2   :  { %11 = vsyncpa [#allocation4], 0 }
   0x3   :  { %13 = vsyncpa [#allocation4 + $0x1], 0  ;;  %s632_s12 = smov 0   ;;  %s634_s13 = smov 0  }
   0x4   :  { %s636_s14 = smov 0   ;;  %s638_s15 = smov 0  }
   0x5   :  { %s640_s16 = smov 0   ;;  %s642_s17 = smov 0  }
   0x6 LB: > { %s409_s18 = sadd.s32 4294967295, %s607_s17   ;;  %s410_s19 = sadd.s32 4294967294, %s607_s17   ;;  %s607_s17 = sphi %s642_s17, %s19_s17   ;;  %s603_s16 = sphi %s640_s16, %s795_s16   ;;  %s599_s15 = sphi %s638_s15, %s794_s15   ;;  %s595_s14 = sphi %s636_s14, %s793_s14   ;;  %s591_s13 = sphi %s634_s13, %s792_s13   ;;  %s587_s12 = sphi %s632_s12, %s791_s12  }
   0x7   : > { %s31_s20 = sadd.s32 1, %s603_s16  ;;  %s40_s21 = sadd.s32 1, %s595_s14 }
   0x8   : > { %p33_p0 = scmp.ge.s32.totalorder %s31_s20, 2  ;;  %p47_p1 = scmp.ne.s32.totalorder %s595_s14, %s591_s13 }
   0x9   : > { %p48_p2 = scmp.eq.s32.totalorder %s607_s17, 0  ;;  %p53_p3 = scmp.ne.s32.totalorder %s591_s13, %s587_s12 }
   0xa   : > { %s797_s20 = smov (%p33_p0, %s31_s20), 0  ;;  %p54_p5 = scmp.eq.s32.totalorder %s409_s18, 0 }
   0xb   : > { %p673_p4 = por %p48_p2, %p47_p1  ;;  %s35_s23 = ssub.s32 %s603_s16, %s797_s20 }
   0xc   : > { %p121_p6 = scmp.eq.s32.totalorder %s409_s18, 1  ;;  %p38_p7 = scmp.eq.s32.totalorder %s35_s23, 0 }
   0xd   : > { %p679_p8 = por %p54_p5, %p53_p3  ;;  %p127_p10 = scmp.eq.s32.totalorder %s410_s19, 1 }
   0xe   : > { %p683_p9 = por %p121_p6, %p47_p1  ;;  %p438_p13 = scmp.lt.s32.totalorder %s607_s17, 2 }
   0xf   : > { %s688_s26 = scalar_select %p38_p7, %s595_s14, %s40_s21  }
  0x10   : > { %p690_p11 = por %p127_p10, %p53_p3  ;;  %s153_s28 = sand.u32 1, %s595_s14  }
  0x11   : > { %s413_s29 = sshll.u32 %s153_s28, 3  ;;  %s424_s30 = sshll.u32 %s603_s16, 7 }
  0x12   : > { %s787_s27 = scalar_select %p690_p11, 1, 0 }
  0x13   : > { %s165_s6 = scalar_lea.hbm %s780_s0, %s424_s30  ;;  %s157_s7 = scalar_lea.vmem [#allocation2], %s413_s29 }
  0x14   : > { %s167_s8 = sshll.u32 %s157_s7, 4  ;;  %p703_p0 = pnand %p438_p13, %p673_p4  ;;  %s168_s8 = int_to_ptr.vmem [resolvable:$true] %s167_s8 }
  0x15   : > { %p416_p1 = scmp.ge.s32.totalorder %s607_s17, 1  ;;  %p172_p2 = scmp.lt.s32.totalorder %s607_s17, 3 }
  0x16   : > { %s154_s10 = scalar_lea.sflag [#allocation3], %s153_s28  ;;  %p501_p3 = pneg %p703_p0 }
  0x17   : > { %s512_s11 = scalar_lea.vmem %s168_s8, 128  ;;  %s609_s18 = smov [#allocation2]  }
  0x18   : > { %p513_p5 = scmp.ne.s32.totalorder %s168_s8, %s512_s11  ;;  %s517_s19 = sshll.u32 %s609_s18, 4  ;;  %s518_s19 = int_to_ptr.vmem [resolvable:$false] %s517_s19 }
  0x19   : > { %s519_s21 = scalar_lea.vmem %s518_s19, 256  ;;  %p520_p10 = scmp.lt.s32.totalorder %s168_s8, %s518_s19 }
  0x1a   : > { %p515_p6 = pnand %p513_p5, %p501_p3  ;;  %p521_p12 = scmp.lt.s32.totalorder %s519_s21, %s512_s11 }
  0x1c   : > { %p516_p7 = pneg %p515_p6  ;;  %p522_p4 = por %p521_p12, %p520_p10 }
  0x1e   : > { %p523_p13 = pnand %p522_p4, %p516_p7 }
  0x20   : > { %526 = shalt.err (!%p523_p13)
}
  0x21   : > { %433 = dma.hbm_to_vmem [thread:$0]  (!%p703_p0), %s165_s6, 128, %s168_s8, %s154_s10  }
  0x22   : > { %p173_p11 = pnand %p416_p1, %p172_p2 }
  0x23   : > { %s718_s22 = sand.u32 (!%p173_p11), 1, %s591_s13  }
  0x24   : > { %176 = sbr.rel (%p173_p11) target bundleno = 189 (0xbd), region = 32  ;;  %s417_s23 = sshll.u32 (!%p173_p11), %s718_s22, 3 }
  0x25   : > { %s179_s28 = scalar_lea.sflag (!%p173_p11), [#allocation3], %s718_s22  ;;  %s182_s29 = scalar_lea.vmem (!%p173_p11), [#allocation2], %s417_s23 }
  0x29   : > { %578 = dma.done.wait (%p679_p8), %s179_s28, 128  }
  0x2a   : > { %580 = vsyncadd (%p679_p8), %s179_s28, 4294967168  ;;  %v610_v0 = vmov 0   ;;  %vm211_vm0 = vcmask 1043456   ;;  %v279_v1 = vld [vmem:[%s781_s1] sm:$0xf]  ;;  %s425_s24 = sshll.u32 %s599_s15, 7 }
  0x2b   : > { %489 = vset.pattern.permute.xlu0 %v610_v0  ;;  %v207_v2 = vld [vmem:[%s182_s29] sm:$0xff]  ;;  %s204_s7 = scalar_lea.vmem [#allocation5], %s417_s23  ;;  %s323_s11 = scalar_lea.hbm %s783_s3, %s425_s24 }
  0x2c   : > { %288 = vperm.xlu0 %489, %v279_v1   ;;  %v209_v3 = vcombine.high %v207_v2, %v207_v2  ;;  %v212_v4 = vsel %vm211_vm0, %v207_v2, 0.0  ;;  %v280_v5 = vld [vmem:[%s782_s2] sm:$0xf]  ;;  %s325_s8 = sshll.u32 %s204_s7, 4  ;;  %s309_s18 = scalar_lea.sflag [#allocation4], %s718_s22  ;;  %s326_s8 = int_to_ptr.vmem [resolvable:$true] %s325_s8 }
  0x2d   : > { %v213_v6 = vrot.slane %v212_v4, 4  ;;  %s527_s19 = scalar_lea.vmem %s326_s8, 128  ;;  %s611_s21 = smov [#allocation5]  }
  0x2e   : > { %v219_v7 = vsel %vm211_vm0, %v209_v3, 0.0  ;;  %p528_p8 = scmp.ne.s32.totalorder %s326_s8, %s527_s19  ;;  %s531_s15 = sshll.u32 %s611_s21, 4  ;;  %s532_s15 = int_to_ptr.vmem [resolvable:$false] %s531_s15 }
  0x2f   : > { %v214_v8 = vadd.f32 %v213_v6, %v212_v4  ;;  %v220_v9 = vrot.slane %v219_v7, 4  ;;  %s533_s23 = scalar_lea.vmem %s532_s15, 256  ;;  %p534_p0 = scmp.lt.s32.totalorder %s326_s8, %s532_s15 }
  0x30   : > { %298 = vperm.xlu0 %489, %v280_v5   ;;  %p529_p11 = pnand %p528_p8, %p683_p9  ;;  %p535_p1 = scmp.lt.s32.totalorder %s533_s23, %s527_s19 }
  0x31   : > { %v215_v10 = vrot.slane %v214_v8, 2  ;;  %v221_v11 = vadd.f32 %v220_v9, %v219_v7 }
  0x32   : > { %p530_p12 = pneg %p529_p11  ;;  %p536_p2 = por %p535_p1, %p534_p0 }
  0x33   : > { %v216_v12 = vadd.f32 %v215_v10, %v214_v8  ;;  %v222_v13 = vrot.slane %v221_v11, 2 }
  0x34   : > { %p537_p3 = pnand %p536_p2, %p530_p12 }
  0x35   : > { %v217_v14 = vrot.slane %v216_v12, 1  ;;  %v223_v15 = vadd.f32 %v222_v13, %v221_v11 }
  0x37   : > { %v218_v16 = vadd.f32 %v217_v14, %v216_v12  ;;  %v224_v17 = vrot.slane %v223_v15, 1 }
  0x39   : > { %v225_v18 = vadd.f32 %v224_v17, %v223_v15  ;;  %v227_v19 = vmul.f32 0.25, %v218_v16 }
  0x3b   : > { %v228_v20 = vmul.f32 0.25, %v225_v18 }
  0x3d   : > { %v231_v21 = vcombine.low %v227_v19, %v228_v20 }
  0x3f   : > { %v233_v22 = vsub.f32 %v207_v2, %v231_v21 }
  0x41   : > { %v234_v23 = vmul.f32 %v233_v22, %v233_v22 }
  0x43   : > { %v236_v24 = vcombine.high %v234_v23, %v234_v23  ;;  %v238_v25 = vsel %vm211_vm0, %v234_v23, 0.0 }
  0x44   : > { %v239_v27 = vrot.slane %v238_v25, 4 }
  0x45   : > { %v245_v26 = vsel %vm211_vm0, %v236_v24, 0.0 }
  0x46   : > { %v246_v28 = vrot.slane %v245_v26, 4  ;;  %v240_v29 = vadd.f32 %v239_v27, %v238_v25 }
  0x48   : > { %v247_v30 = vadd.f32 %v246_v28, %v245_v26  ;;  %v241_v31 = vrot.slane %v240_v29, 2 }
  0x4a   : > { %v248_v32 = vrot.slane %v247_v30, 2  ;;  %v242_v33 = vadd.f32 %v241_v31, %v240_v29 }
  0x4c   : > { %v249_v34 = vadd.f32 %v248_v32, %v247_v30  ;;  %v243_v35 = vrot.slane %v242_v33, 1 }
  0x4e   : > { %v250_v36 = vrot.slane %v249_v34, 1  ;;  %v244_v37 = vadd.f32 %v243_v35, %v242_v33 }
  0x50   : > { %v251_v38 = vadd.f32 %v250_v36, %v249_v34  ;;  %v253_v39 = vmul.f32 0.33333334, %v244_v37 }
  0x52   : > { %v254_v40 = vmul.f32 0.33333334, %v251_v38  ;;  %491 = vrsqrt.f32 %v253_v39  ;;  %vm257_vm1 = vcmp.eq.f32.partialorder %v253_v39, inf  ;;  %v260_v45 = vand.u32 2147483648, %v253_v39 }
  0x53   : > { %vm259_vm3 = vcmp.eq.f32.partialorder %v253_v39, 0.0 }
  0x54   : > { %493 = vrsqrt.f32 %v254_v40  ;;  %vm264_vm2 = vcmp.eq.f32.partialorder %v254_v40, inf  ;;  %v267_v47 = vand.u32 2147483648, %v254_v40  ;;  %vm266_vm4 = vcmp.eq.f32.partialorder %v254_v40, 0.0 }
  0x5f   : > { %v492_v41 = vpop.eup %491 }
  0x60   : > { %v256_v43 = vmul.f32 %v492_v41, %v253_v39 }
  0x61   : > { %v494_v42 = vpop.eup %493 }
  0x62   : > { %v263_v44 = vmul.f32 %v494_v42, %v254_v40  ;;  %v258_v46 = vsel %vm257_vm1, %v253_v39, %v256_v43 }
  0x63   : > { %v261_v49 = vsel %vm259_vm3, %v260_v45, %v258_v46 }
  0x64   : > { %v265_v48 = vsel %vm264_vm2, %v254_v40, %v263_v44  ;;  %v269_v51 = vadd.f32 1e-06, %v261_v49 }
  0x65   : > { %v268_v50 = vsel %vm266_vm4, %v267_v47, %v265_v48 }
  0x66   : > { %v270_v52 = vadd.f32 1e-06, %v268_v50  ;;  %495 = vrcp.f32 %v269_v51 }
  0x68   : > { %497 = vrcp.f32 %v270_v52 }
  0x73   : > { %v496_v53 = vpop.eup %495 }
  0x74   : > { %v273_v55 = vmul.f32 %v496_v53, %v269_v51 }
  0x75   : > { %v498_v54 = vpop.eup %497 }
  0x76   : > { %v274_v56 = vmul.f32 %v498_v54, %v270_v52  ;;  %v275_v57 = vsub.f32 2.0, %v273_v55 }
  0x78   : > { %v276_v58 = vsub.f32 2.0, %v274_v56  ;;  %v277_v59 = vmul.f32 %v496_v53, %v275_v57 }
  0x7a   : > { %v278_v60 = vmul.f32 %v498_v54, %v276_v58 }
  0x7c   : > { %v283_v61 = vcombine.low %v277_v59, %v278_v60 }
  0x7e   : > { %v285_v62 = vmul.f32 %v283_v61, %v233_v22 }
  0x80   : > { %v292_v63 = vcombine.high %v285_v62, %v285_v62 }
  0xa7   : > { %v289_v0 = vpop.permute.xlu0 %288 }
  0xa8   : > { %v294_v1 = vmul.f32 %v289_v0, %v285_v62  ;;  %v295_v2 = vmul.f32 %v292_v63, %v289_v0 }
  0xab   : > { %v299_v3 = vpop.permute.xlu0 %298 }
  0xac   : > { %v301_v4 = vadd.f32 %v299_v3, %v294_v1  ;;  %v302_v5 = vadd.f32 %v299_v3, %v295_v2 }
  0xae   : > { %v305_v6 = vcombine.low %v301_v4, %v302_v5 }
  0xb0   : > { %307 = vst [vmem:[%s204_s7] sm:$0xff] %v305_v6 }
  0xb1   : > { %540 = shalt.err (!%p537_p3)
}
  0xb2   : > { %s541_s28 = scalar_lea.hbm %s323_s11, 128  ;;  %s545_s30 = scalar_lea.hbm %s783_s3, 256 }
  0xb3   : > { %p542_p5 = scmp.ne.s32.totalorder %s323_s11, %s541_s28  ;;  %p546_p10 = scmp.lt.s32.totalorder %s323_s11, %s783_s3 }
  0xb4   : > { %p547_p4 = scmp.lt.s32.totalorder %s545_s30, %s541_s28 }
  0xb5   : > { %p543_p6 = pnand %p542_p5, %p683_p9 }
  0xb6   : > { %p548_p13 = por %p547_p4, %p546_p10 }
  0xb7   : > { %p544_p7 = pneg %p543_p6 }
  0xb9   : > { %p549_p8 = pnand %p548_p13, %p544_p7 }
  0xbb   : > { %552 = shalt.err (!%p549_p8)
}
  0xbc   : > { %428 = dma.vmem_to_hbm [thread:$0]  (%p683_p9), %s326_s8, 128, %s323_s11, %s309_s18  }
  0xbd PF: > { %s337_s6 = sand.u32 1, %s587_s12   ;;  %p789_p11 = scmp.ne.s32.totalorder %s787_s27, 0 }
  0xbe   : > { %p790_p12 = scmp.ge.s32.totalorder %s607_s17, 2  ;;  %s338_s24 = scalar_lea.sflag [#allocation4], %s337_s6 }
  0xc0   : > { %p435_p0 = pnand %p790_p12, %p789_p11 }
  0xc2   : > { %p436_p1 = pneg %p435_p0 }
  0xc4   : > { %582 = dma.done.wait (%p436_p1), %s338_s24, 128  }
  0xc5   : > { %584 = vsyncadd (%p436_p1), %s338_s24, 4294967168  ;;  %s19_s17 = sadd.s32 1, %s607_s17   ;;  %s791_s12 = smov %s591_s13 }
  0xc6   : > { %p16_p2 = scmp.ge.s32.totalorder %s19_s17, 4   ;;  %s792_s13 = smov %s595_s14 }
  0xc7   : > { %s793_s14 = smov %s688_s26  ;;  %s794_s15 = smov %s603_s16 }
  0xc8   : > { %s795_s16 = smov %s797_s20  ;;  %18 = sbr.rel (!%p16_p2) target bundleno = 6 (0x6), region = 77 }
  0xcd   :  { %343 = vsyncpa [#allocation3], 1 }
  0xce   :  { %345 = vsyncpa [#allocation3 + $0x1], 1 }
  0xcf   :  { %346 = vsyncpa [#allocation4], 1 }
  0xd0   :  { %348 = vsyncpa [#allocation4 + $0x1], 1 }

</bundles_post_ra>
